<compile_context>
chip_gen: v7x
topology: tpu7x:2x2x1
jax: 0.10.0
libtpu: 0.0.40
codegen_flags: <defaults>
</compile_context>

<pallas_src>
import functools

import jax
import jax.numpy as jnp
from jax.experimental import pallas as pl
from jax.experimental.pallas import tpu as pltpu


def _round_up(x: int, m: int) -> int:
    return ((x + m - 1) // m) * m


def _pick_tile(dim: int, align: int, cap: int):
    """Return (tile, padded_dim): tile is a multiple of `align`, <= cap,
    and padded_dim is the smallest multiple of tile covering `dim`."""
    padded = _round_up(dim, align)
    tile = min(cap, padded)
    padded = _round_up(padded, tile)
    return tile, padded


def _linear_bias_kernel(x_ref, w_ref, b_ref, o_ref, acc_ref):
    # x_ref: (tm, tk)  activations (all ensemble samples folded into M)
    # w_ref: (tk, tn)  weight, already transposed to (Hin, Hout) layout
    # b_ref: (1, tn)   bias (lane-dense, padded to 128-multiple)
    # o_ref: (tm, tn)  output tile
    # acc_ref: (tm, tn) f32 accumulator (VMEM scratch)
    k = pl.program_id(2)

    @pl.when(k == 0)
    def _():
        acc_ref[...] = jnp.zeros_like(acc_ref)

    acc_ref[...] += jnp.dot(
        x_ref[...], w_ref[...], preferred_element_type=jnp.float32
    )

    @pl.when(k == pl.num_programs(2) - 1)
    def _():
        # Bias add + cast only once per output tile (K-loop epilogue).
        o_ref[...] = (acc_ref[...] + b_ref[...].astype(jnp.float32)).astype(
            o_ref.dtype
        )


@functools.partial(jax.jit, static_argnames=("n_out", "out_dtype"))
def _ensemble_linear(x2d, w_t_pad, b_pad, *, n_out, out_dtype):
    """y = x2d @ w_t + b for all (sample, batch) rows at once.

    x2d:      (M, K)            un-padded activations, M = B*S (or B)
    w_t_pad:  (K_pad, N_pad)    pre-transposed, zero-padded weight
    b_pad:    (1, N_pad)        zero-padded bias
    returns   (M, n_out)
    """
    M, K = x2d.shape
    tk, K_pad = _pick_tile(K, 128, 512)
    tn, N_pad = _pick_tile(n_out, 128, 256)
    assert (K_pad, N_pad) == w_t_pad.shape, (K_pad, N_pad, w_t_pad.shape)
    tm, M_pad = _pick_tile(M, 8, 256)

    x_pad = x2d
    if (M_pad, K_pad) != (M, K):
        # Zero padding: extra K columns contribute 0 to the dot; extra M rows
        # are sliced off below.
        x_pad = jnp.pad(x2d, ((0, M_pad - M), (0, K_pad - K)))

    grid = (M_pad // tm, N_pad // tn, K_pad // tk)

    out = pl.pallas_call(
        _linear_bias_kernel,
        out_shape=jax.ShapeDtypeStruct((M_pad, N_pad), out_dtype),
        grid_spec=pltpu.PrefetchScalarGridSpec(
            num_scalar_prefetch=0,
            grid=grid,
            in_specs=[
                pl.BlockSpec((tm, tk), lambda i, j, k: (i, k)),
                pl.BlockSpec((tk, tn), lambda i, j, k: (k, j)),
                pl.BlockSpec((1, tn), lambda i, j, k: (0, j)),
            ],
            out_specs=pl.BlockSpec((tm, tn), lambda i, j, k: (i, j)),
            scratch_shapes=[pltpu.VMEM((tm, tn), jnp.float32)],
        ),
        compiler_params=pltpu.CompilerParams(
            # M/N parallel (megacore / v7x 2-TC sharding), K is the reduction.
            dimension_semantics=("parallel", "parallel", "arbitrary"),
        ),
    )(x_pad, w_t_pad, b_pad)

    return out[:M, :n_out]


class EnsembleLayer:
    """JAX/Pallas port of midnite's EnsembleLayer with a Linear inner module."""

    # TODO(synk): the PyTorch module wraps an arbitrary `inner` Module; here it
    # is instantiated as a deterministic Linear so the forward can be fused
    # into a single Pallas GEMM.

    def __init__(self, hidden_in: int, hidden_out: int, dtype=jnp.float32):
        key = jax.random.PRNGKey(42)
        kw, kb = jax.random.split(key)
        bound = 1.0 / (hidden_in ** 0.5)
        # torch.nn.Linear-style parameters (weight kept in (Hout, Hin) layout
        # for the reference check; kernel uses the pre-transposed copy below).
        self.weight = jax.random.uniform(
            kw, (hidden_out, hidden_in), dtype=dtype, minval=-bound, maxval=bound
        )
        self.bias = jax.random.uniform(
            kb, (hidden_out,), dtype=dtype, minval=-bound, maxval=bound
        )
        self.hidden_in = hidden_in
        self.hidden_out = hidden_out
        self.stochastic = False

        # One-time layout prep:
        #  * transpose weight to (Hin, Hout) -> no in-kernel transpose
        #  * pad K to the K-tile and N to a 128-multiple -> lane-dense stores
        tk, k_pad = _pick_tile(hidden_in, 128, 512)
        tn, n_pad = _pick_tile(hidden_out, 128, 256)
        w_t = jnp.swapaxes(self.weight, 0, 1)  # (Hin, Hout)
        self._w_t_pad = jnp.pad(
            w_t, ((0, k_pad - hidden_in), (0, n_pad - hidden_out))
        )
        self._b_pad = jnp.pad(self.bias, (0, n_pad - hidden_out)).reshape(1, n_pad)

    def stochastic_eval(self):
        self.stochastic = True
        return self

    def eval(self):
        self.stochastic = False
        return self

    def __call__(self, x):
        if self.stochastic:
            # x: (B, Hin, S) -> fold all S samples and the batch into one GEMM
            # M dimension (weight is shared across samples).  The layout copy
            # is fused by XLA with the padding inside the jitted call.
            B, Hin, S = x.shape
            x2d = jnp.swapaxes(x, 1, 2).reshape(B * S, Hin)        # (B*S, Hin)
            y2d = _ensemble_linear(
                x2d, self._w_t_pad, self._b_pad,
                n_out=self.hidden_out, out_dtype=x.dtype,
            )                                                      # (B*S, Hout)
            return jnp.swapaxes(y2d.reshape(B, S, self.hidden_out), 1, 2)
        else:
            # x: (B, Hin) -> (B, Hout), plain inner forward.
            return _ensemble_linear(
                x, self._w_t_pad, self._b_pad,
                n_out=self.hidden_out, out_dtype=x.dtype,
            )


if __name__ == "__main__":
    B, HIN, HOUT, S = 2, 32, 32, 8

    key = jax.random.PRNGKey(0)
    x_ens = jax.random.normal(key, (B, HIN, S), dtype=jnp.float32)

    layer = EnsembleLayer(HIN, HOUT)

    # --- stochastic (ensemble) mode ---
    layer.stochastic_eval()
    y_ens = jax.block_until_ready(layer(x_ens))
    assert y_ens.shape == (B, HOUT, S), y_ens.shape

    # reference: loop over last axis in plain JAX, stack on new trailing axis
    ref = jnp.stack(
        [x_ens[..., i] @ layer.weight.T + layer.bias for i in range(S)],
        axis=-1,
    )
    assert jnp.allclose(y_ens, ref, atol=1e-5, rtol=1e-5)

    # --- non-stochastic mode (plain inner forward) ---
    layer.eval()
    x_single = x_ens[..., 0]
    y_single = jax.block_until_ready(layer(x_single))
    assert y_single.shape == (B, HOUT)
    assert jnp.allclose(
        y_single, x_single @ layer.weight.T + layer.bias, atol=1e-5, rtol=1e-5
    )

    print("KERNEL_OK")
</pallas_src>

<mosaic_0001>
module attributes {stable_mosaic.version = 11 : i64} {
  func.func @_linear_bias_kernel(%arg0: i32, %arg1: i32, %arg2: i32, %arg3: memref<16x128xf32, #tpu.memory_space<vmem>>, %arg4: memref<128x128xf32, #tpu.memory_space<vmem>>, %arg5: memref<1x128xf32, #tpu.memory_space<vmem>>, %arg6: memref<16x128xf32, #tpu.memory_space<vmem>>, %arg7: memref<16x128xf32, #tpu.memory_space<vmem>>) attributes {dimension_semantics = [#tpu.dimension_semantics<parallel>, #tpu.dimension_semantics<parallel>, #tpu.dimension_semantics<arbitrary>], iteration_bounds = array<i64: 1, 1, 1>, scalar_prefetch = 0 : i64, scratch_operands = 1 : i64, tpu.core_type = #tpu.core_type<tc>, window_params = [{transform_indices = @transform_0, window_bounds = array<i64: 16, 128>}, {transform_indices = @transform_1, window_bounds = array<i64: 128, 128>}, {transform_indices = @transform_2, window_bounds = array<i64: 1, 128>}, {transform_indices = @transform_3, window_bounds = array<i64: 16, 128>}]} {
    %c0_i32 = arith.constant 0 : i32
    %0 = arith.cmpi eq, %arg2, %c0_i32 : i32
    %1 = arith.extui %0 : i1 to i32
    %c0_i32_0 = arith.constant 0 : i32
    %2 = arith.cmpi ne, %1, %c0_i32_0 : i32
    scf.if %2 {
      %cst_10 = arith.constant 0.000000e+00 : f32
      %12 = vector.broadcast %cst_10 : f32 to vector<16x128xf32>
      %c0_11 = arith.constant 0 : index
      %c0_12 = arith.constant 0 : index
      %13 = vector.load %arg7[%c0_11, %c0_12] : memref<16x128xf32, #tpu.memory_space<vmem>>, vector<16x128xf32>
      tpu.vector_store %arg7[%c0_11, %c0_12], %12 {strides = array<i32>} : memref<16x128xf32, #tpu.memory_space<vmem>>, vector<16x128xf32>,
    } else {
    }
    %c0 = arith.constant 0 : index
    %c0_1 = arith.constant 0 : index
    %3 = vector.load %arg7[%c0, %c0_1] : memref<16x128xf32, #tpu.memory_space<vmem>>, vector<16x128xf32>
    %c0_2 = arith.constant 0 : index
    %c0_3 = arith.constant 0 : index
    %4 = vector.load %arg3[%c0_2, %c0_3] : memref<16x128xf32, #tpu.memory_space<vmem>>, vector<16x128xf32>
    %c0_4 = arith.constant 0 : index
    %c0_5 = arith.constant 0 : index
    %5 = vector.load %arg4[%c0_4, %c0_5] : memref<128x128xf32, #tpu.memory_space<vmem>>, vector<128x128xf32>
    %cst = arith.constant dense<0.000000e+00> : vector<16x128xf32>
    %6 = tpu.matmul %4, %5, %cst {dimension_numbers = #tpu.dot_dimension_numbers<[1], [0], [0], [1], [0, 0, 1, 1], [], []>} : vector<16x128xf32>, vector<128x128xf32>, vector<16x128xf32> -> vector<16x128xf32>
    %7 = arith.addf %3, %6 : vector<16x128xf32>
    %c0_6 = arith.constant 0 : index
    %c0_7 = arith.constant 0 : index
    %8 = vector.load %arg7[%c0_6, %c0_7] : memref<16x128xf32, #tpu.memory_space<vmem>>, vector<16x128xf32>
    tpu.vector_store %arg7[%c0_6, %c0_7], %7 {strides = array<i32>} : memref<16x128xf32, #tpu.memory_space<vmem>>, vector<16x128xf32>,
    %c0_i32_8 = arith.constant 0 : i32
    %9 = arith.cmpi eq, %arg2, %c0_i32_8 : i32
    %10 = arith.extui %9 : i1 to i32
    %c0_i32_9 = arith.constant 0 : i32
    %11 = arith.cmpi ne, %10, %c0_i32_9 : i32
    scf.if %11 {
      %c0_10 = arith.constant 0 : index
      %c0_11 = arith.constant 0 : index
      %12 = vector.load %arg7[%c0_10, %c0_11] : memref<16x128xf32, #tpu.memory_space<vmem>>, vector<16x128xf32>
      %c0_12 = arith.constant 0 : index
      %c0_13 = arith.constant 0 : index
      %13 = vector.load %arg5[%c0_12, %c0_13] : memref<1x128xf32, #tpu.memory_space<vmem>>, vector<1x128xf32>
      %14 = vector.broadcast %13 : vector<1x128xf32> to vector<16x128xf32>
      %15 = arith.addf %12, %14 : vector<16x128xf32>
      %c0_14 = arith.constant 0 : index
      %c0_15 = arith.constant 0 : index
      %16 = vector.load %arg6[%c0_14, %c0_15] : memref<16x128xf32, #tpu.memory_space<vmem>>, vector<16x128xf32>
      tpu.vector_store %arg6[%c0_14, %c0_15], %15 {strides = array<i32>} : memref<16x128xf32, #tpu.memory_space<vmem>>, vector<16x128xf32>,
    } else {
    }
    return
  }
  func.func @transform_0(%arg0: i32, %arg1: i32, %arg2: i32) -> (i32, i32) {
    %c0_i32 = arith.constant 0 : i32
    return %arg0, %arg2 : i32, i32
  }
  func.func @transform_1(%arg0: i32, %arg1: i32, %arg2: i32) -> (i32, i32) {
    %c0_i32 = arith.constant 0 : i32
    return %arg2, %arg1 : i32, i32
  }
  func.func @transform_2(%arg0: i32, %arg1: i32, %arg2: i32) -> (i32, i32) {
    %c0_i32 = arith.constant 0 : i32
    %c0_i32_0 = arith.constant 0 : i32
    return %c0_i32, %arg1 : i32, i32
  }
  func.func @transform_3(%arg0: i32, %arg1: i32, %arg2: i32) -> (i32, i32) {
    %c0_i32 = arith.constant 0 : i32
    return %arg0, %arg1 : i32, i32
  }
}

</mosaic_0001>

<bundles_post_ra>
// kernel: _ensemble_linear.1
= control target key start
LH: loop header
LB: loop body
LE: loop exit
PB: predicated region body
PF: predicated region fallthrough
CT: control target
= control target key end

     0   :  { %8 = vsyncpa [#allocation4], 0  ;;  %s368_s0 = inlined_call_operand.vmem [shape: f32[16,128], index: 0, kind: input, shape index: {}]   ;;  %s369_s1 = inlined_call_operand.hbm [shape: f32[128,128], index: 1, kind: input, shape index: {}]   ;;  %s370_s2 = inlined_call_operand.vmem [shape: f32[1,128], index: 2, kind: input, shape index: {}]   ;;  %s371_s3 = inlined_call_operand.hbm [shape: f32[16,128], index: 3, kind: output, shape index: {}]  }
   0x1   :  { %9 = vsyncpa [#allocation5], 0  ;;  %s305_s12 = smov [#allocation3]   ;;  %s257_s16 = scalar_lea.hbm %s369_s1, 2048 }
   0x2   :  { %s17_s13 = sshll.u32 %s305_s12, 4  ;;  %p258_p0 = scmp.ne.s32.totalorder %s369_s1, %s257_s16  ;;  %s18_s13 = int_to_ptr.vmem [resolvable:$true] %s17_s13 }
   0x3   :  { %p261_p1 = scmp.lt.u32.totalorder %s257_s16, %s369_s1 }
   0x5   :  { %p263_p2 = pnand %p261_p1, %p258_p0 }
   0x7   :  { %266 = shalt.err (!%p263_p2)
}
   0x8   :  { %s267_s21 = scalar_lea.vmem %s18_s13, 2048  ;;  %p272_p4 = scmp.lt.s32.totalorder %s18_s13, %s18_s13 }
   0x9   :  { %p268_p3 = scmp.ne.s32.totalorder %s18_s13, %s267_s21  ;;  %p273_p5 = scmp.lt.s32.totalorder %s267_s21, %s267_s21 }
   0xb   :  { %p274_p6 = por %p273_p5, %p272_p4 }
   0xd   :  { %p275_p7 = pnand %p274_p6, %p268_p3 }
   0xf   :  { %278 = shalt.err (!%p275_p7)
}
  0x10   :  { %s306_s22 = smov 128   ;;  %s307_s23 = smov 8  }
  0x11   :  { %23 = dma.hbm_to_vmem [thread:$0]  %s369_s1, 2048, %s18_s13, [#allocation4], %s306_s22, %s306_s22, %s307_s23  }
  0x12   :  { %301 = dma.done.wait [#allocation4], 2048  }
  0x13   :  { %302 = vsyncadd [#allocation4], 4294965248  ;;  %v39_v0 = vld [vmem:[#allocation3] sm:$0xff]  ;;  %v40_v1 = vld [vmem:[#allocation3 + $0x8] sm:$0xff]  ;;  %s308_s4 = smov [#allocation6]  }
  0x14   :  { %v41_v2 = vld [vmem:[#allocation3 + $0x10] sm:$0xff]  ;;  %v221_v3 = vpack.c.bf16 %v40_v1, %v39_v0  ;;  %v42_v4 = vld [vmem:[#allocation3 + $0x18] sm:$0xff]  ;;  %v43_v6 = vld [vmem:[#allocation3 + $0x20] sm:$0xff]  ;;  %s155_s5 = sshll.u32 %s308_s4, 4  ;;  %s156_s5 = int_to_ptr.vmem [resolvable:$true] %s155_s5 }
  0x15   :  { %v225_v5 = vpack.c.bf16 %v42_v4, %v41_v2  ;;  %v44_v7 = vld [vmem:[#allocation3 + $0x28] sm:$0xff]  ;;  %v37_v9 = vld [vmem:[%s368_s0] sm:$0xff]  ;;  %v46_v11 = vld [vmem:[#allocation3 + $0x38] sm:$0xff]  ;;  %s279_s6 = scalar_lea.vmem %s156_s5, 256  ;;  %p284_p9 = scmp.lt.s32.totalorder %s156_s5, %s156_s5 }
  0x16   :  { %222 = vmatprep.subr.bf16.mxu0 %v221_v3  ;;  %v229_v8 = vpack.c.bf16 %v44_v7, %v43_v6  ;;  %v45_v10 = vld [vmem:[#allocation3 + $0x30] sm:$0xff]  ;;  %218 = vmatprep.mubr.f32.mxu0 %v37_v9  ;;  %v47_v13 = vld [vmem:[#allocation3 + $0x40] sm:$0xff]  ;;  %v48_v14 = vld [vmem:[#allocation3 + $0x48] sm:$0xff]  ;;  %p280_p8 = scmp.ne.s32.totalorder %s156_s5, %s279_s6  ;;  %p285_p10 = scmp.lt.s32.totalorder %s279_s6, %s279_s6 }
  0x17   :  { %224 = vmatpush3.bf16.msra.mxu0 %v221_v3  ;;  %v233_v12 = vpack.c.bf16 %v46_v11, %v45_v10  ;;  %v237_v15 = vpack.c.bf16 %v48_v14, %v47_v13  ;;  %v49_v16 = vld [vmem:[#allocation3 + $0x50] sm:$0xff]  ;;  %v50_v17 = vld [vmem:[#allocation3 + $0x58] sm:$0xff]  ;;  %v51_v19 = vld [vmem:[#allocation3 + $0x60] sm:$0xff] }
  0x18   :  { %226 = vmatprep.subr.bf16.mxu0 %v225_v5  ;;  %v241_v18 = vpack.c.bf16 %v50_v17, %v49_v16  ;;  %v52_v20 = vld [vmem:[#allocation3 + $0x68] sm:$0xff]  ;;  %v53_v22 = vld [vmem:[#allocation3 + $0x70] sm:$0xff]  ;;  %v54_v23 = vld [vmem:[#allocation3 + $0x78] sm:$0xff]  ;;  %p286_p11 = por %p285_p10, %p284_p9 }
  0x19   :  { %v245_v21 = vpack.c.bf16 %v52_v20, %v51_v19  ;;  %v249_v24 = vpack.c.bf16 %v54_v23, %v53_v22  ;;  %v38_v25 = vld [vmem:[%s368_s0 + $0x8] sm:$0xff]  ;;  %v167_v26 = vld [vmem:[%s370_s2] ss:$0 sm:$0xff] }
  0x1a   :  { %p287_p12 = pnand %p286_p11, %p280_p8 }
  0x1b   :  { %228 = vmatpush3.bf16.msra.mxu0 %v225_v5 }
  0x1c   :  { %230 = vmatprep.subr.bf16.mxu0 %v229_v8 }
  0x1f   :  { %232 = vmatpush3.bf16.msra.mxu0 %v229_v8 }
  0x20   :  { %234 = vmatprep.subr.bf16.mxu0 %v233_v12 }
  0x23   :  { %236 = vmatpush3.bf16.msra.mxu0 %v233_v12 }
  0x24   :  { %238 = vmatprep.subr.bf16.mxu0 %v237_v15 }
  0x27   :  { %240 = vmatpush3.bf16.msra.mxu0 %v237_v15 }
  0x28   :  { %242 = vmatprep.subr.bf16.mxu0 %v241_v18 }
  0x2b   :  { %244 = vmatpush3.bf16.msra.mxu0 %v241_v18 }
  0x2c   :  { %246 = vmatprep.subr.bf16.mxu0 %v245_v21 }
  0x2f   :  { %248 = vmatpush3.bf16.msra.mxu0 %v245_v21 }
  0x30   :  { %250 = vmatprep.subr.bf16.mxu0 %v249_v24 }
  0x33   :  { %252 = vmatpush3.bf16.msra.mxu0 %v249_v24 }
  0x36   :  { %219 = vmatmul.mubr.f32.vlgmr.msra.gmra.mrb[0].mxu0 %v38_v25 }
 0x109   :  { %v220_v27 = vpop.f32.mrb[0].mxu0 }
 0x10a   :  { %v147_v28 = vadd.f32 %v220_v27, %v167_v26  ;;  %v121_v29 = vpop.f32.mrb[1].mxu0 }
 0x10b   :  { %v146_v30 = vadd.f32 %v167_v26, %v121_v29 }
 0x10c   :  { %149 = vst [vmem:[#allocation6 + $0x8] sm:$0xff] %v147_v28 }
 0x10d   :  { %148 = vst [vmem:[#allocation6] sm:$0xff] %v146_v30 }
 0x10e   :  { %290 = shalt.err (!%p287_p12)
}
 0x10f   :  { %s291_s2 = scalar_lea.hbm %s371_s3, 256 }
 0x110   :  { %p292_p13 = scmp.ne.s32.totalorder %s371_s3, %s291_s2  ;;  %p295_p0 = scmp.lt.u32.totalorder %s291_s2, %s371_s3 }
 0x112   :  { %p297_p1 = pnand %p295_p0, %p292_p13 }
 0x114   :  { %300 = shalt.err (!%p297_p1)
}
 0x115   :  { %161 = dma.vmem_to_hbm [thread:$0]  %s156_s5, 256, %s371_s3, [#allocation5], %s306_s22, %s306_s22, %s307_s23  }
 0x116   :  { %303 = dma.done.wait [#allocation5], 256  }
 0x117   :  { %304 = vsyncadd [#allocation5], 4294967040 }
 0x118   :  { %165 = vsyncpa [#allocation4], 1 }
 0x119   :  { %166 = vsyncpa [#allocation5], 1 }

</bundles_post_ra>
